<compile_context>
chip_gen: v7x
topology: tpu7x:2x2x1
jax: 0.10.0
libtpu: 0.0.40
codegen_flags: <defaults>
</compile_context>

<pallas_src>
import jax
import jax.numpy as jnp
import numpy as np
from jax.experimental import pallas as pl
from jax.experimental.pallas import tpu as pltpu

HIDDEN = 128
LANE = 128
SUBLANE = 8


def _round_up(n, m):
    return ((n + m - 1) // m) * m


def _choose_tb(pb, cap):
    """Largest multiple of 8 that divides pb, <= cap, and <= pb//2 when pb>=16
    (so the batch grid has >=2 steps and v7x can shard it across both TCs)."""
    cap = max(SUBLANE, (cap // SUBLANE) * SUBLANE)
    limit = min(cap, pb // 2) if pb >= 2 * SUBLANE else min(cap, pb)
    best = SUBLANE
    t = SUBLANE
    while t <= limit:
        if pb % t == 0:
            best = t
        t += SUBLANE
    return best


def actor_mlp_kernel(x_ref, w1_ref, b1_ref, w2_ref, b2_ref, w3_ref, b3_ref, o_ref):
    # One batch tile per grid step.  Dots in bf16 with f32 accumulation (MXU);
    # bias-add / ReLU in f32 (correct + fast path on v5e's f32-only VPU).
    a = o_ref.shape[-1]                                                # true action_size
    x = x_ref[...].astype(jnp.bfloat16)                                # [TB, S]
    h1 = jnp.dot(x, w1_ref[...], preferred_element_type=jnp.float32)  # [TB, 128] f32
    h1 = jnp.maximum(h1 + b1_ref[...], 0.0)
    h2 = jnp.dot(h1.astype(jnp.bfloat16), w2_ref[...],
                 preferred_element_type=jnp.float32)
    h2 = jnp.maximum(h2 + b2_ref[...], 0.0)
    out = jnp.dot(h2.astype(jnp.bfloat16), w3_ref[...],
                  preferred_element_type=jnp.float32) + b3_ref[...]   # [TB, a_pad] f32
    # Store only the real action columns (narrow output -> tiny writeback DMA).
    o_ref[...] = out[:, :a].astype(o_ref.dtype)


def pack_actor_params(params):
    """One-time packing of f32 params into kernel-ready layout.

    bf16 weights for the MXU, f32 (1, out) biases, and w3/b3 lane-padded to a
    multiple of 128 so the final matmul tile stays full width.
    """
    w3, b3 = params["w3"], params["b3"]
    action_size = int(w3.shape[1])
    a_pad = _round_up(action_size, LANE)
    w3_p = jnp.zeros((w3.shape[0], a_pad), jnp.bfloat16)
    w3_p = w3_p.at[:, :action_size].set(w3.astype(jnp.bfloat16))
    b3_p = jnp.zeros((1, a_pad), jnp.float32)
    b3_p = b3_p.at[:, :action_size].set(jnp.reshape(b3, (1, -1)))
    return {
        "w1": params["w1"].astype(jnp.bfloat16),
        "b1": jnp.reshape(params["b1"], (1, -1)).astype(jnp.float32),
        "w2": params["w2"].astype(jnp.bfloat16),
        "b2": jnp.reshape(params["b2"], (1, -1)).astype(jnp.float32),
        "w3": w3_p,
        "b3": b3_p,
        "action_size": action_size,
    }


def actor_network_forward(x, packed, *, tb=256):
    """x: [batch, state_size] float32. packed: output of pack_actor_params()."""
    w1, b1 = packed["w1"], packed["b1"]
    w2, b2 = packed["w2"], packed["b2"]
    w3, b3 = packed["w3"], packed["b3"]
    action_size = packed["action_size"]
    a_pad = w3.shape[1]

    batch, state_size = x.shape

    # Pad batch rows to a multiple of 8; pick TB dividing pb (no dead tiles).
    pb = _round_up(max(batch, SUBLANE), SUBLANE)
    TB = _choose_tb(pb, tb)
    grid = (pb // TB,)

    if pb != batch:
        x_p = jnp.zeros((pb, state_size), x.dtype).at[:batch].set(x)
    else:
        x_p = x

    out = pl.pallas_call(
        actor_mlp_kernel,
        out_shape=jax.ShapeDtypeStruct((pb, action_size), jnp.float32),
        grid=grid,
        in_specs=[
            pl.BlockSpec((TB, state_size), lambda i: (i, 0)),      # x: pipelined
            pl.BlockSpec((state_size, HIDDEN), lambda i: (0, 0)),  # w1: VMEM-resident
            pl.BlockSpec((1, HIDDEN), lambda i: (0, 0)),           # b1
            pl.BlockSpec((HIDDEN, HIDDEN), lambda i: (0, 0)),      # w2
            pl.BlockSpec((1, HIDDEN), lambda i: (0, 0)),           # b2
            pl.BlockSpec((HIDDEN, a_pad), lambda i: (0, 0)),       # w3 (lane-padded)
            pl.BlockSpec((1, a_pad), lambda i: (0, 0)),            # b3 (lane-padded)
        ],
        out_specs=pl.BlockSpec((TB, action_size), lambda i: (i, 0)),  # narrow output
        compiler_params=pltpu.CompilerParams(
            dimension_semantics=("parallel",),   # v7x: shard batch over 2 TCs
            vmem_limit_bytes=32 * 1024 * 1024,
        ),
    )(x_p, w1, b1, w2, b2, w3, b3)

    return out[:batch] if pb != batch else out


def init_actor_params(key, state_size, action_size, hidden=HIDDEN):
    """Deterministic init mimicking PyTorch nn.Linear default U[-1/sqrt(fan_in), +]."""
    ks = jax.random.split(key, 6)

    def linear(kw, kb, fan_in, fan_out):
        bound = 1.0 / np.sqrt(fan_in)
        w = jax.random.uniform(kw, (fan_in, fan_out), jnp.float32, -bound, bound)
        b = jax.random.uniform(kb, (1, fan_out), jnp.float32, -bound, bound)
        return w, b

    w1, b1 = linear(ks[0], ks[1], state_size, hidden)
    w2, b2 = linear(ks[2], ks[3], hidden, hidden)
    w3, b3 = linear(ks[4], ks[5], hidden, action_size)
    return {"w1": w1, "b1": b1, "w2": w2, "b2": b2, "w3": w3, "b3": b3}


def actor_network_ref(x, p):
    """Pure-JAX f32 reference matching the PyTorch forward."""
    h1 = jnp.maximum(x @ p["w1"] + p["b1"], 0.0)
    h2 = jnp.maximum(h1 @ p["w2"] + p["b2"], 0.0)
    return h2 @ p["w3"] + p["b3"]


if __name__ == "__main__":
    state_size = 8
    action_size = 4
    batch = 2

    key = jax.random.PRNGKey(0)
    kx, kp = jax.random.split(key)
    x = jax.random.normal(kx, (batch, state_size), dtype=jnp.float32)
    params = init_actor_params(kp, state_size, action_size)
    packed = pack_actor_params(params)   # one-time packing (outside the hot path)

    out = actor_network_forward(x, packed)
    out = jax.block_until_ready(out)

    ref = actor_network_ref(x, params)
    # bf16 matmul operands (f32 accumulation) -> loosened tolerance vs f32 ref.
    np.testing.assert_allclose(np.asarray(out), np.asarray(ref), rtol=5e-2, atol=5e-2)

    print("KERNEL_OK")
</pallas_src>

<mosaic_0001>
module attributes {stable_mosaic.version = 11 : i64} {
  func.func @actor_mlp_kernel(%arg0: i32, %arg1: memref<8x8xf32, #tpu.memory_space<vmem>>, %arg2: memref<8x128xbf16, #tpu.memory_space<vmem>>, %arg3: memref<1x128xf32, #tpu.memory_space<vmem>>, %arg4: memref<128x128xbf16, #tpu.memory_space<vmem>>, %arg5: memref<1x128xf32, #tpu.memory_space<vmem>>, %arg6: memref<128x128xbf16, #tpu.memory_space<vmem>>, %arg7: memref<1x128xf32, #tpu.memory_space<vmem>>, %arg8: memref<8x4xf32, #tpu.memory_space<vmem>>) attributes {dimension_semantics = [#tpu.dimension_semantics<parallel>], iteration_bounds = array<i64: 1>, scalar_prefetch = 0 : i64, scratch_operands = 0 : i64, tpu.core_type = #tpu.core_type<tc>, window_params = [{transform_indices = @transform_0, window_bounds = array<i64: 8, 8>}, {pipeline_mode = #tpu.pipeline_mode<synchronous>, transform_indices = @transform_1, window_bounds = array<i64: 8, 128>}, {pipeline_mode = #tpu.pipeline_mode<synchronous>, transform_indices = @transform_2, window_bounds = array<i64: 1, 128>}, {pipeline_mode = #tpu.pipeline_mode<synchronous>, transform_indices = @transform_3, window_bounds = array<i64: 128, 128>}, {pipeline_mode = #tpu.pipeline_mode<synchronous>, transform_indices = @transform_4, window_bounds = array<i64: 1, 128>}, {pipeline_mode = #tpu.pipeline_mode<synchronous>, transform_indices = @transform_5, window_bounds = array<i64: 128, 128>}, {pipeline_mode = #tpu.pipeline_mode<synchronous>, transform_indices = @transform_6, window_bounds = array<i64: 1, 128>}, {transform_indices = @transform_7, window_bounds = array<i64: 8, 4>}]} {
    %c0 = arith.constant 0 : index
    %c0_0 = arith.constant 0 : index
    %0 = vector.load %arg1[%c0, %c0_0] : memref<8x8xf32, #tpu.memory_space<vmem>>, vector<8x8xf32>
    %1 = arith.truncf %0 : vector<8x8xf32> to vector<8x8xbf16>
    %c0_1 = arith.constant 0 : index
    %c0_2 = arith.constant 0 : index
    %2 = vector.load %arg2[%c0_1, %c0_2] : memref<8x128xbf16, #tpu.memory_space<vmem>>, vector<8x128xbf16>
    %cst = arith.constant dense<0.000000e+00> : vector<8x128xf32>
    %3 = tpu.matmul %1, %2, %cst {dimension_numbers = #tpu.dot_dimension_numbers<[1], [0], [0], [1], [0, 0, 1, 1], [], []>} : vector<8x8xbf16>, vector<8x128xbf16>, vector<8x128xf32> -> vector<8x128xf32>
    %c0_3 = arith.constant 0 : index
    %c0_4 = arith.constant 0 : index
    %4 = vector.load %arg3[%c0_3, %c0_4] : memref<1x128xf32, #tpu.memory_space<vmem>>, vector<1x128xf32>
    %5 = vector.broadcast %4 : vector<1x128xf32> to vector<8x128xf32>
    %6 = arith.addf %3, %5 : vector<8x128xf32>
    %cst_5 = arith.constant 0.000000e+00 : f32
    %7 = vector.broadcast %cst_5 : f32 to vector<8x128xf32>
    %8 = arith.maximumf %6, %7 : vector<8x128xf32>
    %9 = arith.truncf %8 : vector<8x128xf32> to vector<8x128xbf16>
    %c0_6 = arith.constant 0 : index
    %c0_7 = arith.constant 0 : index
    %10 = vector.load %arg4[%c0_6, %c0_7] : memref<128x128xbf16, #tpu.memory_space<vmem>>, vector<128x128xbf16>
    %cst_8 = arith.constant dense<0.000000e+00> : vector<8x128xf32>
    %11 = tpu.matmul %9, %10, %cst_8 {dimension_numbers = #tpu.dot_dimension_numbers<[1], [0], [0], [1], [0, 0, 1, 1], [], []>} : vector<8x128xbf16>, vector<128x128xbf16>, vector<8x128xf32> -> vector<8x128xf32>
    %c0_9 = arith.constant 0 : index
    %c0_10 = arith.constant 0 : index
    %12 = vector.load %arg5[%c0_9, %c0_10] : memref<1x128xf32, #tpu.memory_space<vmem>>, vector<1x128xf32>
    %13 = vector.broadcast %12 : vector<1x128xf32> to vector<8x128xf32>
    %14 = arith.addf %11, %13 : vector<8x128xf32>
    %cst_11 = arith.constant 0.000000e+00 : f32
    %15 = vector.broadcast %cst_11 : f32 to vector<8x128xf32>
    %16 = arith.maximumf %14, %15 : vector<8x128xf32>
    %17 = arith.truncf %16 : vector<8x128xf32> to vector<8x128xbf16>
    %c0_12 = arith.constant 0 : index
    %c0_13 = arith.constant 0 : index
    %18 = vector.load %arg6[%c0_12, %c0_13] : memref<128x128xbf16, #tpu.memory_space<vmem>>, vector<128x128xbf16>
    %cst_14 = arith.constant dense<0.000000e+00> : vector<8x128xf32>
    %19 = tpu.matmul %17, %18, %cst_14 {dimension_numbers = #tpu.dot_dimension_numbers<[1], [0], [0], [1], [0, 0, 1, 1], [], []>} : vector<8x128xbf16>, vector<128x128xbf16>, vector<8x128xf32> -> vector<8x128xf32>
    %c0_15 = arith.constant 0 : index
    %c0_16 = arith.constant 0 : index
    %20 = vector.load %arg7[%c0_15, %c0_16] : memref<1x128xf32, #tpu.memory_space<vmem>>, vector<1x128xf32>
    %21 = vector.broadcast %20 : vector<1x128xf32> to vector<8x128xf32>
    %22 = arith.addf %19, %21 : vector<8x128xf32>
    %23 = vector.extract_strided_slice %22 {offsets = [0, 0], sizes = [8, 4], strides = [1, 1]} : vector<8x128xf32> to vector<8x4xf32>
    %c0_17 = arith.constant 0 : index
    %c0_18 = arith.constant 0 : index
    %24 = vector.load %arg8[%c0_17, %c0_18] : memref<8x4xf32, #tpu.memory_space<vmem>>, vector<8x4xf32>
    tpu.vector_store %arg8[%c0_17, %c0_18], %23 {strides = array<i32>} : memref<8x4xf32, #tpu.memory_space<vmem>>, vector<8x4xf32>,
    return
  }
  func.func @transform_0(%arg0: i32) -> (i32, i32) {
    %c0_i32 = arith.constant 0 : i32
    %c0_i32_0 = arith.constant 0 : i32
    return %arg0, %c0_i32 : i32, i32
  }
  func.func @transform_1(%arg0: i32) -> (i32, i32) {
    %c0_i32 = arith.constant 0 : i32
    %c0_i32_0 = arith.constant 0 : i32
    %c0_i32_1 = arith.constant 0 : i32
    return %c0_i32, %c0_i32_0 : i32, i32
  }
  func.func @transform_2(%arg0: i32) -> (i32, i32) {
    %c0_i32 = arith.constant 0 : i32
    %c0_i32_0 = arith.constant 0 : i32
    %c0_i32_1 = arith.constant 0 : i32
    return %c0_i32, %c0_i32_0 : i32, i32
  }
  func.func @transform_3(%arg0: i32) -> (i32, i32) {
    %c0_i32 = arith.constant 0 : i32
    %c0_i32_0 = arith.constant 0 : i32
    %c0_i32_1 = arith.constant 0 : i32
    return %c0_i32, %c0_i32_0 : i32, i32
  }
  func.func @transform_4(%arg0: i32) -> (i32, i32) {
    %c0_i32 = arith.constant 0 : i32
    %c0_i32_0 = arith.constant 0 : i32
    %c0_i32_1 = arith.constant 0 : i32
    return %c0_i32, %c0_i32_0 : i32, i32
  }
  func.func @transform_5(%arg0: i32) -> (i32, i32) {
    %c0_i32 = arith.constant 0 : i32
    %c0_i32_0 = arith.constant 0 : i32
    %c0_i32_1 = arith.constant 0 : i32
    return %c0_i32, %c0_i32_0 : i32, i32
  }
  func.func @transform_6(%arg0: i32) -> (i32, i32) {
    %c0_i32 = arith.constant 0 : i32
    %c0_i32_0 = arith.constant 0 : i32
    %c0_i32_1 = arith.constant 0 : i32
    return %c0_i32, %c0_i32_0 : i32, i32
  }
  func.func @transform_7(%arg0: i32) -> (i32, i32) {
    %c0_i32 = arith.constant 0 : i32
    %c0_i32_0 = arith.constant 0 : i32
    return %arg0, %c0_i32 : i32, i32
  }
}

</mosaic_0001>

<bundles_post_ra>
// kernel: tpu_custom_call.1
= control target key start
LH: loop header
LB: loop body
LE: loop exit
PB: predicated region body
PF: predicated region fallthrough
CT: control target
= control target key end

     0   :  { %12 = vsyncpa [#allocation3], 0  ;;  %s706_s0 = inlined_call_operand.hbm [shape: f32[8,8], index: 0, kind: input, shape index: {}]   ;;  %s707_s1 = inlined_call_operand.hbm [shape: bf16[8,128], index: 1, kind: input, shape index: {}]   ;;  %s708_s2 = inlined_call_operand.vmem [shape: f32[1,128], index: 2, kind: input, shape index: {}]   ;;  %s709_s3 = inlined_call_operand.hbm [shape: bf16[128,128], index: 3, kind: input, shape index: {}]   ;;  %s710_s4 = inlined_call_operand.vmem [shape: f32[1,128], index: 4, kind: input, shape index: {}]   ;;  %s711_s5 = inlined_call_operand.hbm [shape: bf16[128,128], index: 5, kind: input, shape index: {}]   ;;  %s712_s6 = inlined_call_operand.vmem [shape: f32[1,128], index: 6, kind: input, shape index: {}]   ;;  %s713_s7 = inlined_call_operand.vmem [shape: f32[8,4], index: 7, kind: output, shape index: {}]  }
   0x1   :  { %13 = vsyncpa [#allocation5], 0 }
   0x2   :  { %14 = vsyncpa [#allocation8], 0  ;;  %s575_s24 = smov [#allocation4]   ;;  %s576_s26 = smov [#allocation2]  }
   0x3   :  { %s31_s25 = sshll.u32 %s575_s24, 4  ;;  %s21_s27 = sshll.u32 %s576_s26, 4  ;;  %s32_s25 = int_to_ptr.vmem [resolvable:$true] %s31_s25  ;;  %s22_s27 = int_to_ptr.vmem [resolvable:$true] %s21_s27 }
   0x4   :  { %s481_s30 = scalar_lea.hbm %s707_s1, 64 }
   0x5   :  { %p482_p0 = scmp.ne.s32.totalorder %s707_s1, %s481_s30  ;;  %p485_p1 = scmp.lt.u32.totalorder %s481_s30, %s707_s1 }
   0x7   :  { %p487_p2 = pnand %p485_p1, %p482_p0 }
   0x9   :  { %490 = shalt.err (!%p487_p2)
}
   0xa   :  { %s491_s12 = scalar_lea.vmem %s32_s25, 64  ;;  %p496_p4 = scmp.lt.s32.totalorder %s32_s25, %s32_s25 }
   0xb   :  { %p492_p3 = scmp.ne.s32.totalorder %s32_s25, %s491_s12  ;;  %p497_p5 = scmp.lt.s32.totalorder %s491_s12, %s491_s12 }
   0xd   :  { %p498_p6 = por %p497_p5, %p496_p4 }
   0xf   :  { %p499_p7 = pnand %p498_p6, %p492_p3 }
  0x11   :  { %502 = shalt.err (!%p499_p7)
}
  0x12   :  { %34 = dma.hbm_to_vmem [thread:$0]  %s707_s1, 64, %s32_s25, [#allocation5]  }
  0x13   :  { %s503_s17 = scalar_lea.hbm %s706_s0, 128 }
  0x14   :  { %p504_p8 = scmp.ne.s32.totalorder %s706_s0, %s503_s17  ;;  %p507_p9 = scmp.lt.u32.totalorder %s503_s17, %s706_s0 }
  0x16   :  { %p509_p10 = pnand %p507_p9, %p504_p8 }
  0x18   :  { %512 = shalt.err (!%p509_p10)
}
  0x19   :  { %s513_s22 = scalar_lea.vmem %s22_s27, 128  ;;  %p518_p12 = scmp.lt.s32.totalorder %s22_s27, %s22_s27 }
  0x1a   :  { %p514_p11 = scmp.ne.s32.totalorder %s22_s27, %s513_s22  ;;  %p519_p13 = scmp.lt.s32.totalorder %s513_s22, %s513_s22 }
  0x1c   :  { %p520_p0 = por %p519_p13, %p518_p12 }
  0x1e   :  { %p521_p1 = pnand %p520_p0, %p514_p11 }
  0x20   :  { %524 = shalt.err (!%p521_p1)
}
  0x21   :  { %24 = dma.hbm_to_vmem [thread:$0]  %s706_s0, 128, %s22_s27, [#allocation3]  }
  0x22   :  { %s577_s24 = smov [#allocation6]   ;;  %s525_s29 = scalar_lea.hbm %s709_s3, 1024 }
  0x23   :  { %s42_s25 = sshll.u32 %s577_s24, 4  ;;  %p526_p2 = scmp.ne.s32.totalorder %s709_s3, %s525_s29  ;;  %s43_s25 = int_to_ptr.vmem [resolvable:$true] %s42_s25 }
  0x24   :  { %p529_p3 = scmp.lt.u32.totalorder %s525_s29, %s709_s3 }
  0x26   :  { %p531_p4 = pnand %p529_p3, %p526_p2 }
  0x28   :  { %534 = shalt.err (!%p531_p4)
}
  0x29   :  { %s535_s11 = scalar_lea.vmem %s43_s25, 1024  ;;  %p540_p6 = scmp.lt.s32.totalorder %s43_s25, %s43_s25 }
  0x2a   :  { %p536_p5 = scmp.ne.s32.totalorder %s43_s25, %s535_s11  ;;  %p541_p7 = scmp.lt.s32.totalorder %s535_s11, %s535_s11 }
  0x2c   :  { %p542_p8 = por %p541_p7, %p540_p6 }
  0x2e   :  { %p543_p9 = pnand %p542_p8, %p536_p5 }
  0x30   :  { %546 = shalt.err (!%p543_p9)
}
  0x31   :  { %s578_s0 = smov 64   ;;  %s579_s27 = smov 4  }
  0x32   :  { %48 = dma.hbm_to_vmem [thread:$0]  %s709_s3, 1024, %s43_s25, [#allocation5], %s578_s0, %s578_s0, %s579_s27  }
  0x33   :  { %s580_s14 = smov [#allocation7]   ;;  %s547_s18 = scalar_lea.hbm %s711_s5, 1024 }
  0x34   :  { %s56_s15 = sshll.u32 %s580_s14, 4  ;;  %p548_p10 = scmp.ne.s32.totalorder %s711_s5, %s547_s18  ;;  %s57_s15 = int_to_ptr.vmem [resolvable:$true] %s56_s15 }
  0x35   :  { %p551_p11 = scmp.lt.u32.totalorder %s547_s18, %s711_s5 }
  0x37   :  { %p553_p12 = pnand %p551_p11, %p548_p10 }
  0x39   :  { %556 = shalt.err (!%p553_p12)
}
  0x3a   :  { %s557_s1 = scalar_lea.vmem %s57_s15, 1024  ;;  %p562_p0 = scmp.lt.s32.totalorder %s57_s15, %s57_s15 }
  0x3b   :  { %p558_p13 = scmp.ne.s32.totalorder %s57_s15, %s557_s1  ;;  %p563_p1 = scmp.lt.s32.totalorder %s557_s1, %s557_s1 }
  0x3d   :  { %p564_p2 = por %p563_p1, %p562_p0 }
  0x3f   :  { %p565_p3 = pnand %p564_p2, %p558_p13 }
  0x41   :  { %568 = shalt.err (!%p565_p3)
}
  0x42   :  { %62 = dma.hbm_to_vmem [thread:$0]  %s711_s5, 1024, %s57_s15, [#allocation8], %s578_s0, %s578_s0, %s579_s27  }
  0x43   :  { %569 = dma.done.wait [#allocation3], 128  }
  0x44   :  { %570 = vsyncadd [#allocation3], 4294967168 }
  0x45   :  { %571 = dma.done.wait [#allocation5], 1088  }
  0x46   :  { %572 = vsyncadd [#allocation5], 4294966208 }
  0x47   :  { %573 = dma.done.wait [#allocation8], 1024  }
  0x48   :  { %574 = vsyncadd [#allocation8], 4294966272  ;;  %v581_v0 = vmov 0.0   ;;  %vm582_vm0 = vmmov 0   ;;  %vm92_vm1 = vcmask 1043456   ;;  %v78_v2 = vld [vmem:[#allocation2] sm:$0xff] }
  0x49   :  { %411 = vmatprep.subr.bf16.mxu0 %v581_v0  ;;  %413 = vmatprep.mubr.msk.bf16.mxu0 %vm582_vm0, %v581_v0  ;;  %v80_v1 = vld [vmem:[#allocation4] sm:$0xf]  ;;  %v79_v4 = vpack.c.bf16 %v78_v2, %v78_v2  ;;  %v465_v5 = vld [vmem:[#allocation6] sm:$0xff]   ;;  %vm88_vm2 = vcmask 64512   ;;  %v466_v6 = vld [vmem:[#allocation6 + $0x8] sm:$0xff]   ;;  %vm362_vm3 = vcmask 31744  }
  0x4a   :  { %417 = vmatprep.subr.bf16.mxu1 %v581_v0  ;;  %433 = vmatprep.mubr.msk.bf16.mxu1 %vm582_vm0, %v581_v0  ;;  %v94_v3 = vsel %vm92_vm1, %v80_v1, 0  ;;  %v467_v7 = vld [vmem:[#allocation6 + $0x10] sm:$0xff]   ;;  %v468_v8 = vld [vmem:[#allocation6 + $0x18] sm:$0xff]   ;;  %v469_v9 = vld [vmem:[#allocation6 + $0x20] sm:$0xff]  }
  0x4b   :  { %412 = vmatpush3.bf16.msra.mxu0 %v94_v3  ;;  %418 = vmatpush3.bf16.msra.mxu1 %v465_v5  ;;  %v470_v10 = vld [vmem:[#allocation6 + $0x28] sm:$0xff]   ;;  %v471_v11 = vld [vmem:[#allocation6 + $0x30] sm:$0xff]   ;;  %v472_v12 = vld [vmem:[#allocation6 + $0x38] sm:$0xff]  }
  0x4c   :  { %437 = vmatprep.subr.bf16.mxu0 %v581_v0  ;;  %419 = vmatprep.subr.bf16.mxu1 %v581_v0  ;;  %v473_v13 = vld [vmem:[#allocation7] sm:$0xff]   ;;  %v474_v14 = vld [vmem:[#allocation7 + $0x8] sm:$0xff]   ;;  %v475_v15 = vld [vmem:[#allocation7 + $0x10] sm:$0xff]  }
  0x4d   :  { %v476_v16 = vld [vmem:[#allocation7 + $0x18] sm:$0xff]   ;;  %v477_v17 = vld [vmem:[#allocation7 + $0x20] sm:$0xff]   ;;  %v478_v18 = vld [vmem:[#allocation7 + $0x28] sm:$0xff]  }
  0x4e   :  { %414 = vmatmul.mubr.msk.bf16.vlgmr.msra.gmra.mrb[0].mxu0 %vm88_vm2, %v79_v4  ;;  %v371_v19 = vld [vmem:[%s708_s2] ss:$0 sm:$0xff]  ;;  %v480_v28 = vld [vmem:[#allocation7 + $0x38] sm:$0xff]  }
  0x4f   :  { %453 = vmatprep.mubr.msk.bf16.mxu0 %vm582_vm0, %v581_v0  ;;  %420 = vmatpush3.bf16.msra.mxu1 %v466_v6  ;;  %v479_v27 = vld [vmem:[#allocation7 + $0x30] sm:$0xff]  }
  0x50   :  { %421 = vmatprep.subr.bf16.mxu1 %v581_v0  ;;  %438 = vmatpush3.bf16.msra.mxu0 %v473_v13  ;;  %v373_v29 = vld [vmem:[%s710_s4] ss:$0 sm:$0xff] }
  0x51   :  { %439 = vmatprep.subr.bf16.mxu0 %v581_v0  ;;  %v382_v37 = vld [vmem:[%s712_s6] ss:$0 sm:$0xff] }
  0x53   :  { %422 = vmatpush3.bf16.msra.mxu1 %v467_v7 }
  0x54   :  { %423 = vmatprep.subr.bf16.mxu1 %v581_v0  ;;  %440 = vmatpush3.bf16.msra.mxu0 %v474_v14 }
  0x55   :  { %441 = vmatprep.subr.bf16.mxu0 %v581_v0 }
  0x57   :  { %424 = vmatpush3.bf16.msra.mxu1 %v468_v8 }
  0x58   :  { %425 = vmatprep.subr.bf16.mxu1 %v581_v0  ;;  %442 = vmatpush3.bf16.msra.mxu0 %v475_v15 }
  0x59   :  { %443 = vmatprep.subr.bf16.mxu0 %v581_v0 }
  0x5b   :  { %426 = vmatpush3.bf16.msra.mxu1 %v469_v9 }
  0x5c   :  { %427 = vmatprep.subr.bf16.mxu1 %v581_v0  ;;  %444 = vmatpush3.bf16.msra.mxu0 %v476_v16 }
  0x5d   :  { %445 = vmatprep.subr.bf16.mxu0 %v581_v0 }
  0x5f   :  { %428 = vmatpush3.bf16.msra.mxu1 %v470_v10 }
  0x60   :  { %429 = vmatprep.subr.bf16.mxu1 %v581_v0  ;;  %446 = vmatpush3.bf16.msra.mxu0 %v477_v17 }
  0x61   :  { %447 = vmatprep.subr.bf16.mxu0 %v581_v0 }
  0x63   :  { %430 = vmatpush3.bf16.msra.mxu1 %v471_v11 }
  0x64   :  { %431 = vmatprep.subr.bf16.mxu1 %v581_v0  ;;  %448 = vmatpush3.bf16.msra.mxu0 %v478_v18 }
  0x65   :  { %449 = vmatprep.subr.bf16.mxu0 %v581_v0 }
  0x67   :  { %432 = vmatpush3.bf16.msra.mxu1 %v472_v12 }
  0x68   :  { %450 = vmatpush3.bf16.msra.mxu0 %v479_v27 }
  0x69   :  { %451 = vmatprep.subr.bf16.mxu0 %v581_v0 }
  0x6c   :  { %452 = vmatpush3.bf16.msra.mxu0 %v480_v28 }
 0x121   :  { %v130_v20 = vpop.f32.mrb[0].mxu0 }
 0x122   :  { %v131_v21 = vadd.f32 %v371_v19, %v130_v20  ;;  %v415_v22 = vpop.f32.mrb[1].mxu0 }
 0x123   :  { %v133_v23 = vpop.f32.mrb[2].mxu0 }
 0x124   :  { %v136_v24 = vmax.f32 %v131_v21, 0.0  ;;  %v416_v25 = vpop.f32.mrb[3].mxu0 }
 0x126   :  { %v137_v26 = vpack.c.bf16 %v136_v24, %v136_v24 }
 0x128   :  { %434 = vmatmul.mubr.bf16.vlgmr.msra.gmra.mrb[0].mxu1 %v137_v26 }
 0x1fb   :  { %v243_v30 = vpop.f32.mrb[0].mxu1 }
 0x1fc   :  { %v244_v31 = vadd.f32 %v373_v29, %v243_v30  ;;  %v435_v32 = vpop.f32.mrb[1].mxu1 }
 0x1fd   :  { %v246_v33 = vpop.f32.mrb[2].mxu1 }
 0x1fe   :  { %v249_v34 = vmax.f32 %v244_v31, 0.0  ;;  %v436_v35 = vpop.f32.mrb[3].mxu1 }
 0x200   :  { %v250_v36 = vpack.c.bf16 %v249_v34, %v249_v34 }
 0x202   :  { %454 = vmatmul.mubr.bf16.vlgmr.msra.gmra.mrb[4].mxu0 %v250_v36 }
 0x2d5   :  { %v356_v38 = vpop.f32.mrb[4].mxu0 }
 0x2d6   :  { %v357_v39 = vadd.f32 %v382_v37, %v356_v38  ;;  %v455_v40 = vpop.f32.mrb[5].mxu0 }
 0x2d7   :  { %v359_v41 = vpop.f32.mrb[6].mxu0 }
 0x2d8   :  { %363 = vst.msk [vmem:[%s713_s7] sm:$0xff] %vm362_vm3, %v357_v39  ;;  %v456_v42 = vpop.f32.mrb[7].mxu0 }
 0x2d9   :  { %368 = vsyncpa [#allocation3], 1 }
 0x2da   :  { %369 = vsyncpa [#allocation5], 1 }
 0x2db   :  { %370 = vsyncpa [#allocation8], 1 }

</bundles_post_ra>
